<compile_context>
chip_gen: v6e
topology: v6e:2x2x1
jax: 0.10.0
libtpu: 0.0.40
codegen_flags: <defaults>
</compile_context>

<pallas_src>
import functools

import jax
import jax.numpy as jnp
from jax.experimental import pallas as pl
from jax.experimental.pallas import tpu as pltpu


def _round_up(n, m):
    return ((n + m - 1) // m) * m


def _lane_align():
    """256 for v6e/v7x (2x256^2 MXU); 128 is already full-width on v2-v5."""
    try:
        kind = jax.devices()[0].device_kind.lower()
    except Exception:
        return 256
    for tag in ("v2", "v3", "v4", "v5"):
        if tag in kind:
            return 128
    return 256


def _vmem_capacity_bytes():
    """Physical per-core VMEM; conservative 64 MiB (v7x size) if the query is unavailable."""
    try:
        return int(pltpu.get_tpu_info().vmem_capacity_bytes)
    except Exception:
        return 64 * 2 ** 20


def _autorec_kernel(x_ref, w1_ref, b1_ref, w2_ref, b2_ref, o_ref,
                    hacc_ref, h_ref, *, n_k):
    # Grid = (batch tiles, n_k + n_d); inner axis t is sequential ("arbitrary"):
    #   t in [0, n_k)       : encoder K-step  (accumulate x_blk @ w1_blk into hacc)
    #   t == n_k - 1        : finish encoder  (bias + sigmoid, cast h to bf16)
    #   t in [n_k, n_k+n_d) : decoder D-step  (h @ w2_blk + b2 -> output tile)
    t = pl.program_id(1)

    @pl.when(t == 0)
    def _init():
        hacc_ref[...] = jnp.zeros_like(hacc_ref)

    @pl.when(t < n_k)
    def _encode_step():
        hacc_ref[...] += jnp.dot(x_ref[...], w1_ref[...],
                                 preferred_element_type=jnp.float32)

    @pl.when(t == n_k - 1)
    def _finish_encoder():
        # Bias add + sigmoid in f32.  Dropout(p) in eval mode == identity.
        h = jax.nn.sigmoid(hacc_ref[...] + b1_ref[...])
        h_ref[...] = h.astype(h_ref.dtype)

    @pl.when(t >= n_k)
    def _decode_step():
        y = jnp.dot(h_ref[...], w2_ref[...], preferred_element_type=jnp.float32)
        o_ref[...] = (y + b2_ref[...]).astype(o_ref.dtype)


def prepare_autorec_params(w1, b1, w2, b2, *, td=1024, compute_dtype=jnp.bfloat16):
    """Pad + cast the weights once (hoisted out of the per-call forward).

    w1: (D, E), b1: (E,) or (1, E), w2: (E, D), b2: (D,) or (1, D).
    """
    D, E = w1.shape
    assert w2.shape == (E, D), (w2.shape, (E, D))
    A = _lane_align()

    Ep = _round_up(E, A)
    td_eff = max(A, _round_up(min(td, _round_up(D, A)), A))

    # Back off the d-tile if the per-step footprint (2x headroom, tb=256 assumed)
    # would not fit within the generation's VMEM cap.
    cap = int(0.85 * _vmem_capacity_bytes())
    cs = jnp.dtype(compute_dtype).itemsize
    tb_assumed = 256
    while td_eff > A:
        fp = (2 * tb_assumed * td_eff * cs      # x block (double-buffered)
              + 2 * td_eff * Ep * cs            # w1 block
              + 2 * Ep * td_eff * cs            # w2 block
              + 2 * tb_assumed * td_eff * 4     # output block (worst-case f32)
              + tb_assumed * Ep * (4 + cs)      # h accumulator + h scratch
              + 16 * (Ep + td_eff) * 4)         # biases (sublane-padded)
        if 2 * fp <= cap:
            break
        td_eff = max(A, _round_up(td_eff // 2, A))
    Dp = _round_up(D, td_eff)

    def pad2(a, r, c):
        a = jnp.asarray(a)
        pr, pc = r - a.shape[0], c - a.shape[1]
        return jnp.pad(a, ((0, pr), (0, pc))) if (pr or pc) else a

    return dict(
        w1=pad2(w1, Dp, Ep).astype(compute_dtype),
        b1=pad2(jnp.reshape(jnp.asarray(b1), (1, -1)), 1, Ep).astype(jnp.float32),
        w2=pad2(w2, Ep, Dp).astype(compute_dtype),
        b2=pad2(jnp.reshape(jnp.asarray(b2), (1, -1)), 1, Dp).astype(jnp.float32),
        D=D, E=E, Dp=Dp, Ep=Ep, td=td_eff, compute_dtype=compute_dtype,
    )


def autorec_forward(x, params, *, tb=256, out_dtype=None):
    """x: (B, D) -> (B, D).  Pass out_dtype=jnp.bfloat16 to halve output writeback."""
    B, D = x.shape
    assert D == params["D"], (D, params["D"])
    out_dtype = x.dtype if out_dtype is None else out_dtype
    cdt = params["compute_dtype"]
    Dp, Ep, td = params["Dp"], params["Ep"], params["td"]

    # Batch tile: sublane multiple of 8; prefer >= 2 tiles when B allows so 2-TC
    # parts (v7x) can shard the "parallel" batch axis across both cores.
    tb_cap = _round_up(B, 8)
    if B >= 16:
        tb_cap = min(tb_cap, _round_up(-(-B // 2), 8))
    tb_eff = max(8, _round_up(min(tb, tb_cap), 8))
    Bp = _round_up(B, tb_eff)

    xp = x
    if (Bp, Dp) != (B, D):
        xp = jnp.pad(x, ((0, Bp - B), (0, Dp - D)))
    xp = xp.astype(cdt)

    n_k = Dp // td                    # encoder K-steps == decoder D-steps (same tile)
    grid = (Bp // tb_eff, 2 * n_k)

    csize = jnp.dtype(cdt).itemsize
    osize = jnp.dtype(out_dtype).itemsize
    fp = (2 * tb_eff * td * csize
          + 2 * td * Ep * csize
          + 2 * Ep * td * csize
          + 2 * tb_eff * td * osize
          + tb_eff * Ep * (4 + csize)
          + 16 * (Ep + td) * 4)
    cap = int(0.85 * _vmem_capacity_bytes())
    vmem_limit = int(min(cap, max(32 * 2 ** 20, 2 * fp)))

    kernel = functools.partial(_autorec_kernel, n_k=n_k)
    yp = pl.pallas_call(
        kernel,
        out_shape=jax.ShapeDtypeStruct((Bp, Dp), out_dtype),
        grid_spec=pltpu.PrefetchScalarGridSpec(
            num_scalar_prefetch=0,
            grid=grid,
            in_specs=[
                # x K-block: advances during encoder steps, parked afterwards.
                pl.BlockSpec((tb_eff, td), lambda i, t: (i, jnp.minimum(t, n_k - 1))),
                # w1 K-block (streamed; no full (D, E) residency).
                pl.BlockSpec((td, Ep), lambda i, t: (jnp.minimum(t, n_k - 1), 0)),
                # b1 (tiny constant block).
                pl.BlockSpec((1, Ep), lambda i, t: (0, 0)),
                # w2 output slab: advances during decoder steps.
                pl.BlockSpec((Ep, td), lambda i, t: (0, jnp.maximum(t - n_k, 0))),
                # b2 slab.
                pl.BlockSpec((1, td), lambda i, t: (0, jnp.maximum(t - n_k, 0))),
            ],
            out_specs=pl.BlockSpec((tb_eff, td),
                                   lambda i, t: (i, jnp.maximum(t - n_k, 0))),
            scratch_shapes=[
                pltpu.VMEM((tb_eff, Ep), jnp.float32),   # encoder f32 accumulator
                pltpu.VMEM((tb_eff, Ep), cdt),           # h (bf16 MXU operand)
            ],
        ),
        compiler_params=pltpu.CompilerParams(
            dimension_semantics=("parallel", "arbitrary"),
            vmem_limit_bytes=vmem_limit,
        ),
    )(xp, params["w1"], params["b1"], params["w2"], params["b2"])

    return yp[:B, :D]


if __name__ == "__main__":
    # Small shapes consistent with the module: batch=32, input_dim=512, embedding_dims=128.
    B, D, E = 32, 512, 128
    key = jax.random.PRNGKey(0)
    kx, kw1, kb1, kw2, kb2 = jax.random.split(key, 5)

    x = jax.random.normal(kx, (B, D), dtype=jnp.float32)
    # Parameters ~ Normal(std=0.01), matching nn.init.normal_(param, std=0.01).
    w1 = 0.01 * jax.random.normal(kw1, (D, E), dtype=jnp.float32)   # encoder weight^T
    b1 = 0.01 * jax.random.normal(kb1, (1, E), dtype=jnp.float32)   # encoder bias
    w2 = 0.01 * jax.random.normal(kw2, (E, D), dtype=jnp.float32)   # decoder weight^T
    b2 = 0.01 * jax.random.normal(kb2, (1, D), dtype=jnp.float32)   # decoder bias

    # td=256 so the demo exercises multiple encoder K-steps, decoder D-steps and
    # two batch tiles (grid = (2, 4)); weight pad/cast is done once here.
    params = prepare_autorec_params(w1, b1, w2, b2, td=256)
    y = autorec_forward(x, params)
    y = jax.block_until_ready(y)

    # f32 reference (eval-mode dropout = identity); bf16 MXU operands => loose tolerance.
    y_ref = jax.nn.sigmoid(x @ w1 + b1) @ w2 + b2
    assert y.shape == (B, D)
    assert y.dtype == x.dtype
    err = float(jnp.max(jnp.abs(y - y_ref)))
    assert jnp.allclose(y, y_ref, atol=1e-2, rtol=1e-2), err

    print("KERNEL_OK")
</pallas_src>

<mosaic_0001>
module attributes {stable_mosaic.version = 11 : i64} {
  func.func @_autorec_kernel(%arg0: i32, %arg1: i32, %arg2: memref<16x256xbf16, #tpu.memory_space<vmem>>, %arg3: memref<256x256xbf16, #tpu.memory_space<vmem>>, %arg4: memref<1x256xf32, #tpu.memory_space<vmem>>, %arg5: memref<256x256xbf16, #tpu.memory_space<vmem>>, %arg6: memref<1x256xf32, #tpu.memory_space<vmem>>, %arg7: memref<16x256xf32, #tpu.memory_space<vmem>>, %arg8: memref<16x256xf32, #tpu.memory_space<vmem>>, %arg9: memref<16x256xbf16, #tpu.memory_space<vmem>>) attributes {dimension_semantics = [#tpu.dimension_semantics<parallel>, #tpu.dimension_semantics<arbitrary>], iteration_bounds = array<i64: 2, 4>, scalar_prefetch = 0 : i64, scratch_operands = 2 : i64, tpu.core_type = #tpu.core_type<tc>, window_params = [{transform_indices = @transform_0, window_bounds = array<i64: 16, 256>}, {transform_indices = @transform_1, window_bounds = array<i64: 256, 256>}, {pipeline_mode = #tpu.pipeline_mode<synchronous>, transform_indices = @transform_2, window_bounds = array<i64: 1, 256>}, {transform_indices = @transform_3, window_bounds = array<i64: 256, 256>}, {transform_indices = @transform_4, window_bounds = array<i64: 1, 256>}, {transform_indices = @transform_5, window_bounds = array<i64: 16, 256>}]} {
    %c0_i32 = arith.constant 0 : i32
    %0 = arith.cmpi eq, %arg1, %c0_i32 : i32
    %1 = arith.extui %0 : i1 to i32
    %c0_i32_0 = arith.constant 0 : i32
    %2 = arith.cmpi ne, %1, %c0_i32_0 : i32
    scf.if %2 {
      %cst = arith.constant 0.000000e+00 : f32
      %12 = vector.broadcast %cst : f32 to vector<16x256xf32>
      %c0 = arith.constant 0 : index
      %c0_5 = arith.constant 0 : index
      %13 = vector.load %arg8[%c0, %c0_5] : memref<16x256xf32, #tpu.memory_space<vmem>>, vector<16x256xf32>
      tpu.vector_store %arg8[%c0, %c0_5], %12 {strides = array<i32>} : memref<16x256xf32, #tpu.memory_space<vmem>>, vector<16x256xf32>,
    } else {
    }
    %c2_i32 = arith.constant 2 : i32
    %3 = arith.cmpi slt, %arg1, %c2_i32 : i32
    %4 = arith.extui %3 : i1 to i32
    %c0_i32_1 = arith.constant 0 : i32
    %5 = arith.cmpi ne, %4, %c0_i32_1 : i32
    scf.if %5 {
      %c0 = arith.constant 0 : index
      %c0_5 = arith.constant 0 : index
      %12 = vector.load %arg8[%c0, %c0_5] : memref<16x256xf32, #tpu.memory_space<vmem>>, vector<16x256xf32>
      %c0_6 = arith.constant 0 : index
      %c0_7 = arith.constant 0 : index
      %13 = vector.load %arg2[%c0_6, %c0_7] : memref<16x256xbf16, #tpu.memory_space<vmem>>, vector<16x256xbf16>
      %c0_8 = arith.constant 0 : index
      %c0_9 = arith.constant 0 : index
      %14 = vector.load %arg3[%c0_8, %c0_9] : memref<256x256xbf16, #tpu.memory_space<vmem>>, vector<256x256xbf16>
      %cst = arith.constant dense<0.000000e+00> : vector<16x256xf32>
      %15 = tpu.matmul %13, %14, %cst {dimension_numbers = #tpu.dot_dimension_numbers<[1], [0], [0], [1], [0, 0, 1, 1], [], []>} : vector<16x256xbf16>, vector<256x256xbf16>, vector<16x256xf32> -> vector<16x256xf32>
      %16 = arith.addf %12, %15 : vector<16x256xf32>
      %c0_10 = arith.constant 0 : index
      %c0_11 = arith.constant 0 : index
      %17 = vector.load %arg8[%c0_10, %c0_11] : memref<16x256xf32, #tpu.memory_space<vmem>>, vector<16x256xf32>
      tpu.vector_store %arg8[%c0_10, %c0_11], %16 {strides = array<i32>} : memref<16x256xf32, #tpu.memory_space<vmem>>, vector<16x256xf32>,
    } else {
    }
    %c1_i32 = arith.constant 1 : i32
    %6 = arith.cmpi eq, %arg1, %c1_i32 : i32
    %7 = arith.extui %6 : i1 to i32
    %c0_i32_2 = arith.constant 0 : i32
    %8 = arith.cmpi ne, %7, %c0_i32_2 : i32
    scf.if %8 {
      %c0 = arith.constant 0 : index
      %c0_5 = arith.constant 0 : index
      %12 = vector.load %arg8[%c0, %c0_5] : memref<16x256xf32, #tpu.memory_space<vmem>>, vector<16x256xf32>
      %c0_6 = arith.constant 0 : index
      %c0_7 = arith.constant 0 : index
      %13 = vector.load %arg4[%c0_6, %c0_7] : memref<1x256xf32, #tpu.memory_space<vmem>>, vector<1x256xf32>
      %14 = vector.broadcast %13 : vector<1x256xf32> to vector<16x256xf32>
      %15 = arith.addf %12, %14 : vector<16x256xf32>
      %16 = arith.negf %15 : vector<16x256xf32>
      %17 = math.exp %16 : vector<16x256xf32>
      %cst = arith.constant 1.000000e+00 : f32
      %18 = vector.broadcast %cst : f32 to vector<16x256xf32>
      %19 = arith.addf %18, %17 : vector<16x256xf32>
      %20 = arith.divf %18, %19 : vector<16x256xf32>
      %21 = arith.truncf %20 : vector<16x256xf32> to vector<16x256xbf16>
      %c0_8 = arith.constant 0 : index
      %c0_9 = arith.constant 0 : index
      %22 = vector.load %arg9[%c0_8, %c0_9] : memref<16x256xbf16, #tpu.memory_space<vmem>>, vector<16x256xbf16>
      tpu.vector_store %arg9[%c0_8, %c0_9], %21 {strides = array<i32>} : memref<16x256xbf16, #tpu.memory_space<vmem>>, vector<16x256xbf16>,
    } else {
    }
    %c2_i32_3 = arith.constant 2 : i32
    %9 = arith.cmpi sge, %arg1, %c2_i32_3 : i32
    %10 = arith.extui %9 : i1 to i32
    %c0_i32_4 = arith.constant 0 : i32
    %11 = arith.cmpi ne, %10, %c0_i32_4 : i32
    scf.if %11 {
      %c0 = arith.constant 0 : index
      %c0_5 = arith.constant 0 : index
      %12 = vector.load %arg9[%c0, %c0_5] : memref<16x256xbf16, #tpu.memory_space<vmem>>, vector<16x256xbf16>
      %c0_6 = arith.constant 0 : index
      %c0_7 = arith.constant 0 : index
      %13 = vector.load %arg5[%c0_6, %c0_7] : memref<256x256xbf16, #tpu.memory_space<vmem>>, vector<256x256xbf16>
      %cst = arith.constant dense<0.000000e+00> : vector<16x256xf32>
      %14 = tpu.matmul %12, %13, %cst {dimension_numbers = #tpu.dot_dimension_numbers<[1], [0], [0], [1], [0, 0, 1, 1], [], []>} : vector<16x256xbf16>, vector<256x256xbf16>, vector<16x256xf32> -> vector<16x256xf32>
      %c0_8 = arith.constant 0 : index
      %c0_9 = arith.constant 0 : index
      %15 = vector.load %arg6[%c0_8, %c0_9] : memref<1x256xf32, #tpu.memory_space<vmem>>, vector<1x256xf32>
      %16 = vector.broadcast %15 : vector<1x256xf32> to vector<16x256xf32>
      %17 = arith.addf %14, %16 : vector<16x256xf32>
      %c0_10 = arith.constant 0 : index
      %c0_11 = arith.constant 0 : index
      %18 = vector.load %arg7[%c0_10, %c0_11] : memref<16x256xf32, #tpu.memory_space<vmem>>, vector<16x256xf32>
      tpu.vector_store %arg7[%c0_10, %c0_11], %17 {strides = array<i32>} : memref<16x256xf32, #tpu.memory_space<vmem>>, vector<16x256xf32>,
    } else {
    }
    return
  }
  func.func @transform_0(%arg0: i32, %arg1: i32) -> (i32, i32) {
    %c1_i32 = arith.constant 1 : i32
    %0 = arith.minsi %arg1, %c1_i32 : i32
    %c0_i32 = arith.constant 0 : i32
    return %arg0, %0 : i32, i32
  }
  func.func @transform_1(%arg0: i32, %arg1: i32) -> (i32, i32) {
    %c1_i32 = arith.constant 1 : i32
    %0 = arith.minsi %arg1, %c1_i32 : i32
    %c0_i32 = arith.constant 0 : i32
    %c0_i32_0 = arith.constant 0 : i32
    return %0, %c0_i32 : i32, i32
  }
  func.func @transform_2(%arg0: i32, %arg1: i32) -> (i32, i32) {
    %c0_i32 = arith.constant 0 : i32
    %c0_i32_0 = arith.constant 0 : i32
    %c0_i32_1 = arith.constant 0 : i32
    return %c0_i32, %c0_i32_0 : i32, i32
  }
  func.func @transform_3(%arg0: i32, %arg1: i32) -> (i32, i32) {
    %c2_i32 = arith.constant 2 : i32
    %0 = arith.subi %arg1, %c2_i32 : i32
    %c0_i32 = arith.constant 0 : i32
    %1 = arith.maxsi %0, %c0_i32 : i32
    %c0_i32_0 = arith.constant 0 : i32
    %c0_i32_1 = arith.constant 0 : i32
    return %c0_i32_0, %1 : i32, i32
  }
  func.func @transform_4(%arg0: i32, %arg1: i32) -> (i32, i32) {
    %c2_i32 = arith.constant 2 : i32
    %0 = arith.subi %arg1, %c2_i32 : i32
    %c0_i32 = arith.constant 0 : i32
    %1 = arith.maxsi %0, %c0_i32 : i32
    %c0_i32_0 = arith.constant 0 : i32
    %c0_i32_1 = arith.constant 0 : i32
    return %c0_i32_0, %1 : i32, i32
  }
  func.func @transform_5(%arg0: i32, %arg1: i32) -> (i32, i32) {
    %c2_i32 = arith.constant 2 : i32
    %0 = arith.subi %arg1, %c2_i32 : i32
    %c0_i32 = arith.constant 0 : i32
    %1 = arith.maxsi %0, %c0_i32 : i32
    %c0_i32_0 = arith.constant 0 : i32
    return %arg0, %1 : i32, i32
  }
}

</mosaic_0001>

<bundles_post_ra>
// kernel: tpu_custom_call.1
= control target key start
LH: loop header
LB: loop body
LE: loop exit
PB: predicated region body
PF: predicated region fallthrough
CT: control target
= control target key end

     0   :  { %s2394_s0 = inlined_call_operand.hbm [shape: bf16[32,512], index: 0, kind: input, shape index: {}]   ;;  %s2395_s1 = inlined_call_operand.hbm [shape: bf16[512,256], index: 1, kind: input, shape index: {}]   ;;  %s2396_s2 = inlined_call_operand.vmem [shape: f32[1,256], index: 2, kind: input, shape index: {}]   ;;  %s2397_s3 = inlined_call_operand.hbm [shape: bf16[256,512], index: 3, kind: input, shape index: {}]   ;;  %s2398_s4 = inlined_call_operand.vmem [shape: f32[1,512], index: 4, kind: input, shape index: {}]   ;;  %s2399_s5 = inlined_call_operand.hbm [shape: f32[32,512], index: 5, kind: output, shape index: {}]  }
   0x1   :  { %2424 = sst [smem:[#allocation29_spill]] %s2394_s0 }
   0x2   :  { %2425 = sst [smem:[#allocation30_spill]] %s2395_s1 }
   0x3   :  { %2426 = sst [smem:[#allocation31_spill]] %s2396_s2 }
   0x4   :  { %2427 = sst [smem:[#allocation32_spill]] %s2397_s3 }
   0x5   :  { %2428 = sst [smem:[#allocation33_spill]] %s2398_s4 }
   0x6   :  { %2429 = sst [smem:[#allocation34_spill]] %s2399_s5 }
   0x7   :  { %10 = vsyncpa [#allocation5], 0 }
   0x8   :  { %12 = vsyncpa [#allocation5 + $0x1], 0 }
   0x9   :  { %13 = vsyncpa [#allocation8], 0 }
   0xa   :  { %15 = vsyncpa [#allocation8 + $0x1], 0 }
   0xb   :  { %16 = vsyncpa [#allocation6], 0 }
   0xc   :  { %18 = vsyncpa [#allocation6 + $0x1], 0  ;;  %s1896_s18 = smov 0   ;;  %s1898_s19 = smov 0  }
   0xd   :  { %s1900_s20 = smov 0   ;;  %s1902_s21 = smov 0  }
   0xe   :  { %s1904_s22 = smov 0   ;;  %s1906_s23 = smov 0  }
   0xf   :  { %s1908_s24 = smov 0   ;;  %s1910_s25 = smov 0  }
  0x10   :  { %s1912_s26 = smov 0   ;;  %s1914_s27 = smov 0  }
  0x11   :  { %s1916_s28 = smov 0   ;;  %s1918_s29 = smov 0  }
  0x12   :  { %s1920_s30 = smov 0   ;;  %s1922_s6 = smov 0  }
  0x13   :  { %s1924_s7 = smov 0   ;;  %s1926_s8 = smov 0  }
  0x14   :  { %s1928_s9 = smov 0  }
  0x15 LB: > { %2430 = sst [smem:[#allocation15_spill]] %s1789_s18  ;;  %s1980_s10 = sadd.s32 4294967295, %s1853_s9   ;;  %s1853_s9 = sphi %s1928_s9, %s24_s9   ;;  %s1849_s8 = sphi %s1926_s8, %s2500_s8   ;;  %s1845_s7 = sphi %s1924_s7, %s2499_s7   ;;  %s1841_s6 = sphi %s1922_s6, %s2498_s6   ;;  %s1837_s30 = sphi %s1920_s30, %s2511_s30   ;;  %s1833_s29 = sphi %s1918_s29, %s2510_s29   ;;  %s1829_s28 = sphi %s1916_s28, %s2509_s28   ;;  %s1825_s27 = sphi %s1914_s27, %s2508_s27   ;;  %s1821_s26 = sphi %s1912_s26, %s2496_s26   ;;  %s1817_s25 = sphi %s1910_s25, %s2507_s25   ;;  %s1813_s24 = sphi %s1908_s24, %s2494_s24   ;;  %s1809_s23 = sphi %s1906_s23, %s2506_s23   ;;  %s1805_s22 = sphi %s1904_s22, %s2505_s22   ;;  %s1801_s21 = sphi %s1902_s21, %s2504_s21   ;;  %s1797_s20 = sphi %s1900_s20, %s2503_s20   ;;  %s1793_s19 = sphi %s1898_s19, %s2492_s19   ;;  %s1789_s18 = sphi %s1896_s18, %s2501_s18  }
  0x16   : > { %2431 = sst [smem:[#allocation16_spill]] %s1793_s19  ;;  %s33_s11 = sadd.s32 1, %s1845_s7 }
  0x17   : > { %2432 = sst [smem:[#allocation17_spill]] %s1797_s20  ;;  %p1983_p0 = scmp.ge.s32.totalorder %s33_s11, 4 }
  0x18   : > { %2433 = sst [smem:[#allocation18_spill]] %s1817_s25  ;;  %p40_p1 = scmp.lt.s32.totalorder %s1845_s7, 1 }
  0x19   : > { %2434 = sst [smem:[#allocation19_spill]] %s1821_s26  ;;  %p57_p2 = scmp.eq.s32.totalorder %s1853_s9, 0 }
  0x1a   : > { %2435 = sst [smem:[#allocation20_spill]] %s1837_s30  ;;  %p2407_p3 = scmp.eq.s32.totalorder %s1980_s10, 0 }
  0x1b   : > { %2436 = sst [smem:[#allocation21_spill]] %s1841_s6  ;;  %s2513_s11 = smov (%p1983_p0, %s33_s11), 0 }
  0x1c   : > { %2437 = sst [smem:[#allocation22_spill]] %s1845_s7  ;;  %p42_p4 = scmp.lt.s32.totalorder %s2513_s11, 1 }
  0x1d   : > { %2438 = sst [smem:[#allocation23_spill]] %s1849_s8  ;;  %s79_s14 = sadd.s32 1, %s1821_s26 }
  0x1e   : > { %2440 = sst [smem:[#allocation24_spill]] %s2513_s11  ;;  %p86_p5 = scmp.ne.s32.totalorder %s1821_s26, %s1817_s25 }
  0x1f   : > { %s1995_s13 = scalar_select %p40_p1, %s1845_s7, 1 }
  0x20   : > { %p92_p6 = scmp.ne.s32.totalorder %s1817_s25, %s1813_s24  ;;  %p2005_p7 = por %p86_p5, %p57_p2 }
  0x21   : > { %s43_s15 = scalar_select %p42_p4, %s2513_s11, 1 }
  0x22   : > { %p2011_p8 = por %p92_p6, %p2407_p3  ;;  %p2406_p11 = scmp.lt.s32.totalorder %s1853_s9, 8 }
  0x23   : > { %s2016_s5 = ssub.s32 %s1995_s13, %s43_s15  ;;  %s264_s6 = sand.u32 1, %s1853_s9  }
  0x24   : > { %s2442_s17 = scalar_select %p2011_p8, 1, 0 }
  0x25   : > { %p77_p10 = scmp.eq.s32.totalorder %s2016_s5, 0  ;;  %s266_s2 = sand.u32 1, %s1821_s26  }
  0x26   : > { %2443 = sst [smem:[#allocation25_spill]] %s2442_s17  ;;  %s1200_s4 = sshll.u32 %s266_s2, 8 }
  0x27   : > { %s2022_s24 = scalar_select %p77_p10, %s1821_s26, %s79_s14  }
  0x28   : > { %s1303_s30 = sshll.u32 %s1995_s13, 12  ;;  %s2445_s1 = sld [smem:[#allocation30_spill]] }
  0x29   : > { %2444 = sst [smem:[#allocation26_spill]] %s2022_s24  ;;  %s268_s19 = scalar_lea.vmem [#allocation7], %s1200_s4 }
  0x2a   : > { %s278_s20 = sshll.u32 %s268_s19, 4  ;;  %p2034_p12 = pnand %p2406_p11, %p2005_p7  ;;  %s279_s20 = int_to_ptr.vmem [resolvable:$true] %s278_s20 }
  0x2b   : > { %p1208_p13 = scmp.ge.s32.totalorder %s1853_s9, 1  ;;  %p324_p1 = scmp.lt.s32.totalorder %s1853_s9, 9 }
  0x2c   : > { %s2040_s14 = scalar_lea.sflag [#allocation8], %s264_s6  ;;  %p1595_p4 = pneg %p2034_p12 }
  0x2d   : > { %s1606_s2 = scalar_lea.vmem %s279_s20, 4096  ;;  %s1855_s3 = smov [#allocation7]  }
  0x2e   : > { %s277_s18 = scalar_lea.hbm %s2445_s1, %s1303_s30  ;;  %p1607_p5 = scmp.ne.s32.totalorder %s279_s20, %s1606_s2 }
  0x2f   : > { %s1611_s4 = sshll.u32 %s1855_s3, 4  ;;  %s1612_s4 = int_to_ptr.vmem [resolvable:$false] %s1611_s4 }
  0x30   : > { %p1609_p6 = pnand %p1607_p5, %p1595_p4  ;;  %s1613_s19 = scalar_lea.vmem %s1612_s4, 8192 }
  0x31   : > { %p1614_p7 = scmp.lt.s32.totalorder %s279_s20, %s1612_s4  ;;  %p1615_p9 = scmp.lt.s32.totalorder %s1613_s19, %s1606_s2 }
  0x32   : > { %p1610_p10 = pneg %p1609_p6 }
  0x33   : > { %p1616_p11 = por %p1615_p9, %p1614_p7 }
  0x35   : > { %p1617_p3 = pnand %p1616_p11, %p1610_p10 }
  0x37   : > { %1620 = shalt.err (!%p1617_p3)
}
  0x38   : > { %s2408_s25 = smov 128   ;;  %s2410_s30 = smov 8  }
  0x39   : > { %1322 = dma.hbm_to_vmem [thread:$0]  (!%p2034_p12), %s277_s18, 4096, %s279_s20, %s2040_s14, %s2408_s25, %s2408_s25, %s2410_s30  }
  0x3a   : > { %p2054_p3 = pnand %p1208_p13, %p324_p1  ;;  %s36_s16 = sadd.s32 1, %s1849_s8 }
  0x3b   : > { %s2515_s16 = smov (!%p1983_p0, %s36_s16), %s1849_s8  ;;  %s49_s2 = sadd.s32 1, %s1833_s29 }
  0x3c   : > { %p56_p9 = scmp.ne.s32.totalorder %s1833_s29, %s1829_s28  ;;  %p38_p11 = scmp.ge.s32.totalorder %s2515_s16, 2 }
  0x3d   : > { %p62_p4 = scmp.ne.s32.totalorder %s1829_s28, %s1825_s27  ;;  %s238_s18 = sand.u32 1, %s1833_s29  }
  0x3e   : > { %p2069_p5 = por %p57_p2, %p56_p9  ;;  %s2517_s16 = smov (%p38_p11, %s2515_s16), 0 }
  0x3f   : > { %2449 = sst [smem:[#allocation27_spill]] %s2517_s16  ;;  %p2450_p12 = scmp.eq.s32.totalorder %s1980_s10, 0 }
  0x40   : > { %s2084_s12 = ssub.s32 %s1849_s8, %s2517_s16  ;;  %s1195_s27 = sshll.u32 %s238_s18, 4 }
  0x41   : > { %p2078_p13 = por %p2450_p12, %p62_p4  ;;  %s46_s3 = sor.u32 %s2016_s5, %s2084_s12 }
  0x42   : > { %p47_p0 = scmp.eq.s32.totalorder %s46_s3, 0  ;;  %s1197_s4 = sshll.u32 %s1995_s13, 1 }
  0x43   : > { %s2451_s20 = scalar_select %p2078_p13, 1, 0 }
  0x44   : > { %s1301_s19 = sshll.u32 %s1849_s8, 3  ;;  %s242_s25 = scalar_lea.vmem [#allocation4], %s1195_s27 }
  0x45   : > { %2452 = sst [smem:[#allocation28_spill]] %s2451_s20  ;;  %s254_s30 = sshll.u32 %s242_s25, 4  ;;  %s255_s30 = int_to_ptr.vmem [resolvable:$true] %s254_s30 }
  0x46   : > { %s2091_s1 = scalar_select %p47_p0, %s1833_s29, %s49_s2  }
  0x47   : > { %s251_s24 = sadd.s32 %s1301_s19, %s1197_s4  ;;  %p2453_p1 = scmp.lt.s32.totalorder %s1853_s9, 8 }
  0x48   : > { %s1199_s26 = sshll.u32 %s251_s24, 6  ;;  %s2455_s0 = sld [smem:[#allocation29_spill]] }
  0x49   : > { %p2097_p6 = pnand %p2453_p1, %p2069_p5  ;;  %s239_s13 = scalar_lea.sflag [#allocation5], %s238_s18 }
  0x4a   : > { %s1634_s25 = scalar_lea.vmem %s255_s30, 256  ;;  %s1858_s2 = smov [#allocation4]  }
  0x4b   : > { %p1623_p10 = pneg %p2097_p6  ;;  %p1635_p7 = scmp.ne.s32.totalorder %s255_s30, %s1634_s25 }
  0x4c   : > { %s1639_s24 = sshll.u32 %s1858_s2, 4  ;;  %s1640_s24 = int_to_ptr.vmem [resolvable:$false] %s1639_s24 }
  0x4d   : > { %p1637_p9 = pnand %p1635_p7, %p1623_p10  ;;  %s1641_s15 = scalar_lea.vmem %s1640_s24, 512 }
  0x4e   : > { %s253_s5 = scalar_lea.hbm %s2455_s0, %s1199_s26  ;;  %p1642_p4 = scmp.lt.s32.totalorder %s255_s30, %s1640_s24 }
  0x4f   : > { %p1638_p11 = pneg %p1637_p9  ;;  %p1643_p5 = scmp.lt.s32.totalorder %s1641_s15, %s1634_s25 }
  0x51   : > { %p1644_p12 = por %p1643_p5, %p1642_p4 }
  0x53   : > { %p1645_p0 = pnand %p1644_p12, %p1638_p11 }
  0x55   : > { %1648 = shalt.err (!%p1645_p0)
}
  0x56   : > { %s2418_s27 = smov 256   ;;  %s2456_s26 = smov 8  }
  0x57   : > { %s2457_s16 = smov 128   ;;  %s2458_s18 = sld [smem:[#allocation17_spill]] }
  0x58   : > { %1319 = dma.hbm_to_vmem [thread:$0]  (!%p2097_p6), %s253_s5, 256, %s255_s30, %s239_s13, %s2418_s27, %s2457_s16, %s2456_s26  }
  0x59   : > { %s1186_s20 = sadd.s32 4294967294, %s1853_s9   ;;  %s2459_s3 = sld [smem:[#allocation16_spill]] }
  0x5a   : > { %s1187_s17 = sadd.s32 4294967294, %s1845_s7  ;;  %s1188_s4 = sadd.s32 4294967294, %s2513_s11 }
  0x5b   : > { %p124_p1 = scmp.gt.s32.totalorder %s1187_s17, 0  ;;  %p127_p10 = scmp.gt.s32.totalorder %s1188_s4, 0 }
  0x5c   : > { %s2460_s19 = sld [smem:[#allocation15_spill]]  ;;  %s132_s25 = sadd.s32 1, %s1809_s23 }
  0x5d   : > { %p139_p7 = scmp.ne.s32.totalorder %s1809_s23, %s1805_s22  ;;  %s2519_s17 = smov (!%p124_p1, %s1187_s17), 0 }
  0x5e   : > { %s2521_s4 = smov (!%p127_p10, %s1188_s4), 0  ;;  %p145_p9 = scmp.ne.s32.totalorder %s1805_s22, %s1801_s21 }
  0x5f   : > { %p2119_p6 = por %p139_p7, %p57_p2  ;;  %s129_s5 = ssub.s32 %s2519_s17, %s2521_s4 }
  0x60   : > { %s198_s13 = sadd.s32 1, %s2458_s18  ;;  %p130_p11 = scmp.eq.s32.totalorder %s129_s5, 0 }
  0x61   : > { %p2462_p4 = scmp.eq.s32.totalorder %s1980_s10, 0  ;;  %s195_s24 = sor.u32 %s129_s5, %s2084_s12 }
  0x62   : > { %p208_p12 = scmp.ne.s32.totalorder %s2458_s18, %s2459_s3  ;;  %p196_p0 = scmp.eq.s32.totalorder %s195_s24, 0 }
  0x63   : > { %p2128_p5 = por %p145_p9, %p2462_p4  ;;  %p2464_p2 = scmp.eq.s32.totalorder %s1980_s10, 7 }
  0x64   : > { %s2136_s15 = scalar_select %p130_p11, %s1809_s23, %s132_s25  }
  0x65   : > { %s2463_s2 = scalar_select %p2128_p5, 1, 0 }
  0x66   : > { %p2140_p1 = por %p2464_p2, %p208_p12  ;;  %p214_p10 = scmp.ne.s32.totalorder %s2459_s3, %s2460_s19 }
  0x67   : > { %p215_p7 = scmp.eq.s32.totalorder %s1186_s20, 7  ;;  %s2523_s18 = smov (!%p196_p0, %s2458_s18), %s198_s13 }
  0x68   : > { %s2465_s27 = scalar_select %p2140_p1, 1, 0 }
  0x69   : > { %p2149_p9 = por %p215_p7, %p214_p10  ;;  %s290_s4 = sand.u32 1, %s1809_s23  }
  0x6a   : > { %s1204_s0 = sshll.u32 %s290_s4, 8  ;;  %s1304_s12 = sshll.u32 %s2519_s17, 7 }
  0x6b   : > { %s2466_s21 = scalar_select %p2149_p9, 1, 0 }
  0x6c   : > { %s2467_s11 = sld [smem:[#allocation32_spill]]  ;;  %s292_s8 = scalar_lea.vmem [#allocation9], %s1204_s0 }
  0x6d   : > { %s302_s7 = sshll.u32 %s292_s8, 4  ;;  %p2468_p11 = scmp.lt.s32.totalorder %s1853_s9, 8  ;;  %s303_s7 = int_to_ptr.vmem [resolvable:$true] %s302_s7 }
  0x6e   : > { %s1662_s20 = scalar_lea.vmem %s303_s7, 4096  ;;  %s1860_s17 = smov [#allocation9]  }
  0x6f   : > { %p2161_p4 = pnand %p2468_p11, %p2119_p6  ;;  %p1663_p0 = scmp.ne.s32.totalorder %s303_s7, %s1662_s20 }
  0x70   : > { %s1667_s19 = sshll.u32 %s1860_s17, 4  ;;  %s1668_s19 = int_to_ptr.vmem [resolvable:$false] %s1667_s19 }
  0x71   : > { %p1651_p12 = pneg %p2161_p4  ;;  %p1670_p7 = scmp.lt.s32.totalorder %s303_s7, %s1668_s19 }
  0x72   : > { %s301_s24 = scalar_lea.hbm %s2467_s11, %s1304_s12  ;;  %s1669_s11 = scalar_lea.vmem %s1668_s19, 8192 }
  0x73   : > { %p1665_p2 = pnand %p1663_p0, %p1651_p12  ;;  %p1671_p9 = scmp.lt.s32.totalorder %s1669_s11, %s1662_s20 }
  0x75   : > { %p1666_p10 = pneg %p1665_p2  ;;  %p1672_p1 = por %p1671_p9, %p1670_p7 }
  0x77   : > { %p1673_p5 = pnand %p1672_p1, %p1666_p10 }
  0x79   : > { %1676 = shalt.err (!%p1673_p5)
}
  0x7a   : > { %s2470_s0 = smov 256   ;;  %328 = sbr.rel (%p2054_p3) target bundleno = 815 (0x32f), region = 40 }
  0x7b   : > { %1325 = dma.hbm_to_vmem [thread:$0]  (!%p2161_p4), %s301_s24, 4096, %s303_s7, %s2040_s14, %s2470_s0, %s2457_s16, %s2456_s26  }
  0x7c   : > { %s330_s30 = sand.u32 (!%p2054_p3), 1, %s1829_s28  }
  0x7d   : > { %s2176_s13 = sshll.u32 (!%p2054_p3), %s330_s30, 4  ;;  %s331_s4 = scalar_lea.sflag (!%p2054_p3), [#allocation5], %s330_s30 }
  0x7e   : > { %s334_s12 = scalar_lea.vmem (!%p2054_p3), [#allocation4], %s2176_s13 }
  0x7f   : > { %1772 = dma.done.wait (%p2078_p13), %s331_s4, 256  }
  0x80   : > { %1774 = vsyncadd (%p2078_p13), %s331_s4, 4294967040  ;;  %s2472_s5 = sld [smem:[#allocation18_spill]]  ;;  %s339_s7 = sand.u32 1, %s1980_s10  }
  0x81   : > { %s340_s26 = scalar_lea.sflag [#allocation8], %s339_s7 }
  0x86   : > { %s341_s14 = sand.u32 1, %s2472_s5  }
  0x87   : > { %s1210_s6 = sshll.u32 %s341_s14, 8 }
  0x88   : > { %s2185_s16 = scalar_lea.vmem [#allocation7], %s1210_s6 }
  0x89   : > { %1776 = dma.done.wait (%p2011_p8), %s340_s26, 4096  }
  0x8a   : > { %1778 = vsyncadd (%p2011_p8), %s340_s26, 4294963200  ;;  %s350_s24 = sand.u32 1, %s1805_s22   ;;  %p2474_p3 = scmp.ne.s32.totalorder %s2463_s2, 0 }
  0x8b   : > { %s1211_s3 = sshll.u32 %s350_s24, 8 }
  0x8c   : > { %s2192_s20 = scalar_lea.vmem [#allocation9], %s1211_s3 }
  0x8d   : > { %1780 = dma.done.wait (%p2474_p3), %s340_s26, 4096  }
  0x8e   : > { %1782 = vsyncadd (%p2474_p3), %s340_s26, 4294963200  ;;  %s2475_s10 = sld [smem:[#allocation16_spill]] }
  0x8f   : > { %s2476_s17 = sld [smem:[#allocation20_spill]] }
  0x90   : > { %s2477_s5 = sld [smem:[#allocation33_spill]] }
  0x94   : > { %s393_s19 = sand.u32 1, %s2475_s10  }
  0x95   : > { %s1213_s11 = sadd.s32 4294967294, %s2476_s17  ;;  %s1212_s0 = sshll.u32 %s393_s19, 5 }
  0x96   : > { %p408_p13 = scmp.gt.s32.totalorder %s1213_s11, 0  ;;  %s2212_s7 = scalar_lea.vmem [#allocation10], %s1212_s0 }
  0x97   : > { %p1215_p6 = scmp.ne.s32.totalorder %s2476_s17, 0 }
  0x98   : > { %s2525_s11 = smov (!%p408_p13, %s1213_s11), 0 }
  0x99   : > { %s2202_s8 = sshll.u32 %s2525_s11, 1 }
  0x9a   : > { %p411_p8 = scmp.lt.s32.totalorder %s2202_s8, 3  ;;  %426 = sbr.rel (%p1215_p6) target bundleno = 162 (0xa2), region = 56 }
  0x9c   : > { %s2206_s30 = scalar_select %p411_p8, %s2202_s8, 3 }
  0x9e   : > { %s413_s25 = scalar_lea.vmem %s2477_s5, %s2206_s30 }
  0x9f   : > { %v1861_v0 = vmov 0.0  }
  0xa0   : > { %427 = vst [vmem:[#allocation2 + $0x10] sm:$0xff] %v1861_v0  ;;  %428 = vst [vmem:[#allocation2] sm:$0xff] %v1861_v0 }
  0xa1   : > { %429 = vst [vmem:[#allocation2 + $0x18] sm:$0xff] %v1861_v0  ;;  %430 = vst [vmem:[#allocation2 + $0x8] sm:$0xff] %v1861_v0 }
  0xa2 PF: > { %s2478_s14 = sld [smem:[#allocation20_spill]] }
  0xa8   : > { %p1216_p5 = scmp.ge.s32.totalorder %s2478_s14, 2 }
  0xaa   : > { %434 = sbr.rel (%p1216_p5) target bundleno = 442 (0x1ba), region = 60 }
  0xaf   : > { %v1475_v1 = vld [vmem:[%s2185_s16 + $0x74] ss:$8 sps:$4 sm:$0xff]   ;;  %v1477_v2 = vld [vmem:[%s2185_s16 + $0x70] ss:$8 sps:$4 sm:$0xff]   ;;  %v1478_v3 = vld [vmem:[%s2185_s16 + $0x64] ss:$8 sps:$4 sm:$0xff]  }
  0xb0   : > { %643 = vmatprep.subr.bf16.mxu0 %v1475_v1  ;;  %v1480_v4 = vld [vmem:[%s2185_s16 + $0x60] ss:$8 sps:$4 sm:$0xff]   ;;  %v1481_v5 = vld [vmem:[%s2185_s16 + $0x54] ss:$8 sps:$4 sm:$0xff]   ;;  %v1483_v6 = vld [vmem:[%s2185_s16 + $0x50] ss:$8 sps:$4 sm:$0xff]  }
  0xb1   : > { %644 = vmatpush1.bf16.msra.mxu0 %v1477_v2  ;;  %v1484_v7 = vld [vmem:[%s2185_s16 + $0x44] ss:$8 sps:$4 sm:$0xff]   ;;  %v1486_v8 = vld [vmem:[%s2185_s16 + $0x40] ss:$8 sps:$4 sm:$0xff]   ;;  %v1487_v9 = vld [vmem:[%s2185_s16 + $0x34] ss:$8 sps:$4 sm:$0xff]  }
  0xb2   : > { %645 = vmatprep.subr.bf16.mxu0 %v1478_v3  ;;  %v1489_v10 = vld [vmem:[%s2185_s16 + $0x30] ss:$8 sps:$4 sm:$0xff]   ;;  %v1490_v11 = vld [vmem:[%s2185_s16 + $0x24] ss:$8 sps:$4 sm:$0xff]   ;;  %v1492_v12 = vld [vmem:[%s2185_s16 + $0x20] ss:$8 sps:$4 sm:$0xff]  }
  0xb3   : > { %v1493_v13 = vld [vmem:[%s2185_s16 + $0x14] ss:$8 sps:$4 sm:$0xff]   ;;  %v1495_v15 = vld [vmem:[%s2185_s16 + $0x10] ss:$8 sps:$4 sm:$0xff]   ;;  %v1496_v16 = vld [vmem:[%s2185_s16 + $0x4] ss:$8 sps:$4 sm:$0xff]  }
  0xb4   : > { %v1525_v14 = vld [vmem:[%s334_s12 + $0x4] ss:$8 sps:$4 sm:$0xff]   ;;  %v1498_v17 = vld [vmem:[%s2185_s16] ss:$8 sps:$4 sm:$0xff]   ;;  %v1501_v19 = vld [vmem:[%s2185_s16 + $0xf0] ss:$8 sps:$4 sm:$0xff]  }
  0xb5   : > { %646 = vmatpush1.bf16.msra.mxu0 %v1480_v4  ;;  %675 = vmatprep.mubr.bf16.mxu0 %v1525_v14  ;;  %v1499_v18 = vld [vmem:[%s2185_s16 + $0xf4] ss:$8 sps:$4 sm:$0xff]   ;;  %v1502_v20 = vld [vmem:[%s2185_s16 + $0xe4] ss:$8 sps:$4 sm:$0xff]   ;;  %v1504_v21 = vld [vmem:[%s2185_s16 + $0xe0] ss:$8 sps:$4 sm:$0xff]  }
  0xb6   : > { %647 = vmatprep.subr.bf16.mxu0 %v1481_v5  ;;  %v1505_v22 = vld [vmem:[%s2185_s16 + $0xd4] ss:$8 sps:$4 sm:$0xff]   ;;  %v1507_v23 = vld [vmem:[%s2185_s16 + $0xd0] ss:$8 sps:$4 sm:$0xff]   ;;  %v1508_v24 = vld [vmem:[%s2185_s16 + $0xc4] ss:$8 sps:$4 sm:$0xff]  }
  0xb7   : > { %v1510_v25 = vld [vmem:[%s2185_s16 + $0xc0] ss:$8 sps:$4 sm:$0xff]   ;;  %v1511_v26 = vld [vmem:[%s2185_s16 + $0xb4] ss:$8 sps:$4 sm:$0xff]   ;;  %v1513_v27 = vld [vmem:[%s2185_s16 + $0xb0] ss:$8 sps:$4 sm:$0xff]  }
  0xb8   : > { %v1514_v28 = vld [vmem:[%s2185_s16 + $0xa4] ss:$8 sps:$4 sm:$0xff]   ;;  %v1516_v29 = vld [vmem:[%s2185_s16 + $0xa0] ss:$8 sps:$4 sm:$0xff]   ;;  %v1517_v30 = vld [vmem:[%s2185_s16 + $0x94] ss:$8 sps:$4 sm:$0xff]  }
  0xb9   : > { %648 = vmatpush1.bf16.msra.mxu0 %v1483_v6  ;;  %v1519_v31 = vld [vmem:[%s2185_s16 + $0x90] ss:$8 sps:$4 sm:$0xff]   ;;  %v1520_v32 = vld [vmem:[%s2185_s16 + $0x84] ss:$8 sps:$4 sm:$0xff]   ;;  %v1522_v33 = vld [vmem:[%s2185_s16 + $0x80] ss:$8 sps:$4 sm:$0xff]  }
  0xba   : > { %649 = vmatprep.subr.bf16.mxu0 %v1484_v7  ;;  %v1523_v34 = vld [vmem:[%s334_s12] ss:$8 sps:$4 sm:$0xff]  }
  0xbb   : > { %v435_v35 = vld [vmem:[#allocation2 + $0x10] sm:$0xff]  ;;  %v436_v37 = vld [vmem:[#allocation2] sm:$0xff]  ;;  %v437_v40 = vld [vmem:[#allocation2 + $0x18] sm:$0xff] }
  0xbc   : > { %v438_v43 = vld [vmem:[#allocation2 + $0x8] sm:$0xff] }
  0xbd   : > { %650 = vmatpush1.bf16.msra.mxu0 %v1486_v8 }
  0xbe   : > { %651 = vmatprep.subr.bf16.mxu0 %v1487_v9 }
  0xc1   : > { %652 = vmatpush1.bf16.msra.mxu0 %v1489_v10 }
  0xc2   : > { %653 = vmatprep.subr.bf16.mxu0 %v1490_v11 }
  0xc5   : > { %654 = vmatpush1.bf16.msra.mxu0 %v1492_v12 }
  0xc6   : > { %655 = vmatprep.subr.bf16.mxu0 %v1493_v13 }
  0xc9   : > { %656 = vmatpush1.bf16.msra.mxu0 %v1495_v15 }
  0xca   : > { %657 = vmatprep.subr.bf16.mxu0 %v1496_v16 }
  0xcd   : > { %658 = vmatpush1.bf16.msra.mxu0 %v1498_v17 }
  0xce   : > { %659 = vmatprep.subr.bf16.mxu0 %v1499_v18 }
  0xd1   : > { %660 = vmatpush2.bf16.msra.mxu0 %v1501_v19 }
  0xd2   : > { %661 = vmatprep.subr.bf16.mxu0 %v1502_v20 }
  0xd5   : > { %662 = vmatpush2.bf16.msra.mxu0 %v1504_v21 }
  0xd6   : > { %663 = vmatprep.subr.bf16.mxu0 %v1505_v22 }
  0xd9   : > { %664 = vmatpush2.bf16.msra.mxu0 %v1507_v23 }
  0xda   : > { %665 = vmatprep.subr.bf16.mxu0 %v1508_v24 }
  0xdd   : > { %666 = vmatpush2.bf16.msra.mxu0 %v1510_v25 }
  0xde   : > { %667 = vmatprep.subr.bf16.mxu0 %v1511_v26 }
  0xe1   : > { %668 = vmatpush2.bf16.msra.mxu0 %v1513_v27 }
  0xe2   : > { %669 = vmatprep.subr.bf16.mxu0 %v1514_v28 }
  0xe5   : > { %670 = vmatpush2.bf16.msra.mxu0 %v1516_v29 }
  0xe6   : > { %671 = vmatprep.subr.bf16.mxu0 %v1517_v30 }
  0xe9   : > { %672 = vmatpush2.bf16.msra.mxu0 %v1519_v31 }
  0xea   : > { %673 = vmatprep.subr.bf16.mxu0 %v1520_v32 }
  0xed   : > { %674 = vmatpush2.bf16.msra.mxu0 %v1522_v33 }
  0xf0   : > { %676 = vmatmul.mubr.bf16.vlgmr.msra.gmra.mxu0 %v1523_v34 }
 0x1b0   : > { %v677_v36 = vpop.f32.mrf.mxu0 }
 0x1b1   : > { %v686_v38 = vadd.f32 %v677_v36, %v435_v35 }
 0x1b2   : > { %v679_v39 = vpop.f32.mrf.mxu0 }
 0x1b3   : > { %690 = vst [vmem:[#allocation2 + $0x10] sm:$0xff] %v686_v38  ;;  %v687_v41 = vadd.f32 %v679_v39, %v436_v37 }
 0x1b4   : > { %v681_v42 = vpop.f32.mrf.mxu0 }
 0x1b5   : > { %691 = vst [vmem:[#allocation2] sm:$0xff] %v687_v41  ;;  %v688_v44 = vadd.f32 %v681_v42, %v437_v40 }
 0x1b6   : > { %v683_v45 = vpop.f32.mrf.mxu0 }
 0x1b7   : > { %692 = vst [vmem:[#allocation2 + $0x18] sm:$0xff] %v688_v44  ;;  %v689_v46 = vadd.f32 %v683_v45, %v438_v43 }
 0x1b9   : > { %693 = vst [vmem:[#allocation2 + $0x8] sm:$0xff] %v689_v46 }
 0x1ba PF: > { %s2479_s13 = sld [smem:[#allocation20_spill]] }
 0x1c0   : > { %p1251_p1 = scmp.ne.s32.totalorder %s2479_s13, 1 }
 0x1c1   : > { %s2480_s26 = sld [smem:[#allocation31_spill]] (!%p1251_p1) }
 0x1c2   : > { %697 = sbr.rel (%p1251_p1) target bundleno = 503 (0x1f7), region = 64 }
 0x1c7   : > { %v704_v47 = vlaneseq  ;;  %v702_v49 = vld [vmem:[%s2480_s26] sm:$0x3]  ;;  %v698_v50 = vld [vmem:[#allocation2 + $0x10] sm:$0xff]  ;;  %v700_v54 = vld [vmem:[#allocation2 + $0x18] sm:$0xff] }
 0x1c8   : > { %v699_v53 = vld [vmem:[#allocation2] sm:$0xff]  ;;  %v701_v55 = vld [vmem:[#allocation2 + $0x8] sm:$0xff] }
 0x1c9   : > { %v705_v48 = vshrl.u32 %v704_v47, 7 }
 0x1cb   : > { %v706_v51 = vsub.s32 0, %v705_v48  ;;  %v710_v52 = vsub.s32 1, %v705_v48 }
 0x1cd   : > { %v707_v56 = vrot.slane %v702_v49, %v706_v51  ;;  %v711_v57 = vrot.slane %v702_v49, %v710_v52 }
 0x1cf   : > { %v714_v58 = vadd.f32 %v707_v56, %v698_v50  ;;  %v715_v59 = vadd.f32 %v711_v57, %v699_v53  ;;  %v716_v60 = vadd.f32 %v707_v56, %v700_v54  ;;  %v717_v61 = vadd.f32 %v711_v57, %v701_v55 }
 0x1d1   : > { %v1252_v62 = vmul.f32 -1.442695, %v714_v58  ;;  %v1253_v63 = vmul.f32 -1.442695, %v715_v59  ;;  %v1254_v0 = vmul.f32 -1.442695, %v716_v60 }
 0x1d2   : > { %v1255_v1 = vmul.f32 -1.442695, %v717_v61 }
 0x1d3   : > { %1526 = vpow2.f32 %v1252_v62 }
 0x1d4   : > { %1528 = vpow2.f32 %v1253_v63 }
 0x1d5   : > { %1530 = vpow2.f32 %v1254_v0 }
 0x1d6   : > { %1532 = vpow2.f32 %v1255_v1 }
 0x1e0   : > { %v1527_v2 = vpop.eup %1526 }
 0x1e1   : > { %v1529_v3 = vpop.eup %1528  ;;  %v730_v4 = vadd.f32 1.0, %v1527_v2 }
 0x1e2   : > { %v1531_v5 = vpop.eup %1530  ;;  %v731_v6 = vadd.f32 1.0, %v1529_v3 }
 0x1e3   : > { %v1533_v7 = vpop.eup %1532  ;;  %1534 = vrcp.f32 %v730_v4  ;;  %v732_v8 = vadd.f32 1.0, %v1531_v5 }
 0x1e4   : > { %1536 = vrcp.f32 %v731_v6  ;;  %v733_v9 = vadd.f32 1.0, %v1533_v7 }
 0x1e5   : > { %1538 = vrcp.f32 %v732_v8 }
 0x1e6   : > { %1540 = vrcp.f32 %v733_v9 }
 0x1f0   : > { %v1535_v10 = vpop.eup %1534 }
 0x1f1   : > { %v1537_v11 = vpop.eup %1536 }
 0x1f2   : > { %v1539_v12 = vpop.eup %1538  ;;  %v1305_v13 = vpack.c.bf16 %v1537_v11, %v1535_v10 }
 0x1f3   : > { %v1541_v14 = vpop.eup %1540 }
 0x1f4   : > { %754 = vst [vmem:[#allocation3] sm:$0xff] %v1305_v13  ;;  %v1306_v15 = vpack.c.bf16 %v1541_v14, %v1539_v12 }
 0x1f6   : > { %755 = vst [vmem:[#allocation3 + $0x8] sm:$0xff] %v1306_v15 }
 0x1f7 PF: > { %s2481_s16 = sld [smem:[#allocation20_spill]] }
 0x1fd   : > { %p1258_p9 = scmp.lt.s32.totalorder %s2481_s16, 2 }
 0x1ff   : > { %759 = sbr.rel (%p1258_p9) target bundleno = 783 (0x30f), region = 68 }
 0x204   : > { %v1542_v16 = vld [vmem:[%s2192_s20 + $0x74] ss:$8 sps:$4 sm:$0xff]   ;;  %v1544_v17 = vld [vmem:[%s2192_s20 + $0x70] ss:$8 sps:$4 sm:$0xff]   ;;  %v1545_v18 = vld [vmem:[%s2192_s20 + $0x64] ss:$8 sps:$4 sm:$0xff]   ;;  %v796_v50 = vlaneseq }
 0x205   : > { %976 = vmatprep.subr.bf16.mxu0 %v1542_v16  ;;  %v1547_v19 = vld [vmem:[%s2192_s20 + $0x60] ss:$8 sps:$4 sm:$0xff]   ;;  %v1548_v20 = vld [vmem:[%s2192_s20 + $0x54] ss:$8 sps:$4 sm:$0xff]   ;;  %v1550_v21 = vld [vmem:[%s2192_s20 + $0x50] ss:$8 sps:$4 sm:$0xff]  }
 0x206   : > { %977 = vmatpush1.bf16.msra.mxu0 %v1544_v17  ;;  %v1551_v22 = vld [vmem:[%s2192_s20 + $0x44] ss:$8 sps:$4 sm:$0xff]   ;;  %v1553_v23 = vld [vmem:[%s2192_s20 + $0x40] ss:$8 sps:$4 sm:$0xff]   ;;  %v1554_v24 = vld [vmem:[%s2192_s20 + $0x34] ss:$8 sps:$4 sm:$0xff]  }
 0x207   : > { %978 = vmatprep.subr.bf16.mxu0 %v1545_v18  ;;  %v1556_v25 = vld [vmem:[%s2192_s20 + $0x30] ss:$8 sps:$4 sm:$0xff]   ;;  %v1557_v26 = vld [vmem:[%s2192_s20 + $0x24] ss:$8 sps:$4 sm:$0xff]   ;;  %v1559_v27 = vld [vmem:[%s2192_s20 + $0x20] ss:$8 sps:$4 sm:$0xff]  }
 0x208   : > { %v1560_v28 = vld [vmem:[%s2192_s20 + $0x14] ss:$8 sps:$4 sm:$0xff]   ;;  %v1562_v30 = vld [vmem:[%s2192_s20 + $0x10] ss:$8 sps:$4 sm:$0xff]   ;;  %v1563_v31 = vld [vmem:[%s2192_s20 + $0x4] ss:$8 sps:$4 sm:$0xff]  }
 0x209   : > { %v1592_v29 = vld [vmem:[#allocation3 + $0x4] ss:$8 sps:$4 sm:$0xff]   ;;  %v1565_v32 = vld [vmem:[%s2192_s20] ss:$8 sps:$4 sm:$0xff]   ;;  %v1568_v34 = vld [vmem:[%s2192_s20 + $0xf0] ss:$8 sps:$4 sm:$0xff]  }
 0x20a   : > { %979 = vmatpush1.bf16.msra.mxu0 %v1547_v19  ;;  %1008 = vmatprep.mubr.bf16.mxu0 %v1592_v29  ;;  %v1566_v33 = vld [vmem:[%s2192_s20 + $0xf4] ss:$8 sps:$4 sm:$0xff]   ;;  %v1569_v35 = vld [vmem:[%s2192_s20 + $0xe4] ss:$8 sps:$4 sm:$0xff]   ;;  %v1571_v36 = vld [vmem:[%s2192_s20 + $0xe0] ss:$8 sps:$4 sm:$0xff]  }
 0x20b   : > { %980 = vmatprep.subr.bf16.mxu0 %v1548_v20  ;;  %v1572_v37 = vld [vmem:[%s2192_s20 + $0xd4] ss:$8 sps:$4 sm:$0xff]   ;;  %v1574_v38 = vld [vmem:[%s2192_s20 + $0xd0] ss:$8 sps:$4 sm:$0xff]   ;;  %v1575_v39 = vld [vmem:[%s2192_s20 + $0xc4] ss:$8 sps:$4 sm:$0xff]  }
 0x20c   : > { %v1577_v40 = vld [vmem:[%s2192_s20 + $0xc0] ss:$8 sps:$4 sm:$0xff]   ;;  %v1578_v41 = vld [vmem:[%s2192_s20 + $0xb4] ss:$8 sps:$4 sm:$0xff]   ;;  %v1580_v42 = vld [vmem:[%s2192_s20 + $0xb0] ss:$8 sps:$4 sm:$0xff]  }
 0x20d   : > { %v1581_v43 = vld [vmem:[%s2192_s20 + $0xa4] ss:$8 sps:$4 sm:$0xff]   ;;  %v1583_v44 = vld [vmem:[%s2192_s20 + $0xa0] ss:$8 sps:$4 sm:$0xff]   ;;  %v1584_v45 = vld [vmem:[%s2192_s20 + $0x94] ss:$8 sps:$4 sm:$0xff]  }
 0x20e   : > { %981 = vmatpush1.bf16.msra.mxu0 %v1550_v21  ;;  %v1586_v46 = vld [vmem:[%s2192_s20 + $0x90] ss:$8 sps:$4 sm:$0xff]   ;;  %v1587_v47 = vld [vmem:[%s2192_s20 + $0x84] ss:$8 sps:$4 sm:$0xff]   ;;  %v1589_v48 = vld [vmem:[%s2192_s20 + $0x80] ss:$8 sps:$4 sm:$0xff]  }
 0x20f   : > { %982 = vmatprep.subr.bf16.mxu0 %v1551_v22  ;;  %v1590_v49 = vld [vmem:[#allocation3] ss:$8 sps:$4 sm:$0xff]   ;;  %v797_v51 = vshrl.u32 %v796_v50, 7 }
 0x210   : > { %v794_v53 = vld [vmem:[%s413_s25] sm:$0x3] }
 0x211   : > { %v798_v52 = vsub.s32 0, %v797_v51  ;;  %v802_v54 = vsub.s32 1, %v797_v51 }
 0x212   : > { %983 = vmatpush1.bf16.msra.mxu0 %v1553_v23 }
 0x213   : > { %984 = vmatprep.subr.bf16.mxu0 %v1554_v24  ;;  %v799_v55 = vrot.slane %v794_v53, %v798_v52  ;;  %v803_v56 = vrot.slane %v794_v53, %v802_v54 }
 0x216   : > { %985 = vmatpush1.bf16.msra.mxu0 %v1556_v25 }
 0x217   : > { %986 = vmatprep.subr.bf16.mxu0 %v1557_v26 }
 0x21a   : > { %987 = vmatpush1.bf16.msra.mxu0 %v1559_v27 }
 0x21b   : > { %988 = vmatprep.subr.bf16.mxu0 %v1560_v28 }
 0x21e   : > { %989 = vmatpush1.bf16.msra.mxu0 %v1562_v30 }
 0x21f   : > { %990 = vmatprep.subr.bf16.mxu0 %v1563_v31 }
 0x222   : > { %991 = vmatpush1.bf16.msra.mxu0 %v1565_v32 }
 0x223   : > { %992 = vmatprep.subr.bf16.mxu0 %v1566_v33 }
 0x226   : > { %993 = vmatpush2.bf16.msra.mxu0 %v1568_v34 }
 0x227   : > { %994 = vmatprep.subr.bf16.mxu0 %v1569_v35 }
 0x22a   : > { %995 = vmatpush2.bf16.msra.mxu0 %v1571_v36 }
 0x22b   : > { %996 = vmatprep.subr.bf16.mxu0 %v1572_v37 }
 0x22e   : > { %997 = vmatpush2.bf16.msra.mxu0 %v1574_v38 }
 0x22f   : > { %998 = vmatprep.subr.bf16.mxu0 %v1575_v39 }
 0x232   : > { %999 = vmatpush2.bf16.msra.mxu0 %v1577_v40 }
 0x233   : > { %1000 = vmatprep.subr.bf16.mxu0 %v1578_v41 }
 0x236   : > { %1001 = vmatpush2.bf16.msra.mxu0 %v1580_v42 }
 0x237   : > { %1002 = vmatprep.subr.bf16.mxu0 %v1581_v43 }
 0x23a   : > { %1003 = vmatpush2.bf16.msra.mxu0 %v1583_v44 }
 0x23b   : > { %1004 = vmatprep.subr.bf16.mxu0 %v1584_v45 }
 0x23e   : > { %1005 = vmatpush2.bf16.msra.mxu0 %v1586_v46 }
 0x23f   : > { %1006 = vmatprep.subr.bf16.mxu0 %v1587_v47 }
 0x242   : > { %1007 = vmatpush2.bf16.msra.mxu0 %v1589_v48 }
 0x245   : > { %1009 = vmatmul.mubr.bf16.vlgmr.msra.gmra.mxu0 %v1590_v49 }
 0x305   : > { %v1010_v57 = vpop.f32.mrf.mxu0 }
 0x306   : > { %v1011_v58 = vadd.f32 %v1010_v57, %v799_v55 }
 0x307   : > { %v1012_v59 = vpop.f32.mrf.mxu0 }
 0x308   : > { %1019 = vst [vmem:[%s2212_s7] sm:$0xff] %v1011_v58  ;;  %v1013_v60 = vadd.f32 %v1012_v59, %v803_v56 }
 0x309   : > { %v1014_v61 = vpop.f32.mrf.mxu0 }
 0x30a   : > { %1020 = vst [vmem:[%s2212_s7 + $0x8] sm:$0xff] %v1013_v60  ;;  %v1015_v62 = vadd.f32 %v1014_v61, %v799_v55 }
 0x30b   : > { %v1016_v63 = vpop.f32.mrf.mxu0 }
 0x30c   : > { %1021 = vst [vmem:[%s2212_s7 + $0x10] sm:$0xff] %v1015_v62  ;;  %v1017_v0 = vadd.f32 %v1016_v63, %v803_v56 }
 0x30e   : > { %1022 = vst [vmem:[%s2212_s7 + $0x18] sm:$0xff] %v1017_v0 }
 0x30f PF: > { %s2483_s20 = sld [smem:[#allocation21_spill]]  ;;  %s1043_s30 = sshll.u32 %s2212_s7, 4  ;;  %s2301_s30 = int_to_ptr.vmem [resolvable:$true] %s1043_s30 }
 0x310   : > { %s2485_s25 = sld [smem:[#allocation34_spill]]  ;;  %s2310_s12 = scalar_lea.sflag [#allocation6], %s393_s19 }
 0x311   : > { %s1677_s6 = scalar_lea.vmem %s2301_s30, 512  ;;  %p2487_p4 = scmp.ne.s32.totalorder %s2465_s27, 0 }
 0x312   : > { %p1678_p11 = scmp.ne.s32.totalorder %s2301_s30, %s1677_s6 }
 0x314   : > { %p1679_p12 = pnand %p1678_p11, %p2487_p4 }
 0x315   : > { %s1307_s11 = sshll.u32 %s2483_s20, 3 }
 0x316   : > { %s1040_s0 = sadd.s32 %s1307_s11, %s2202_s8  ;;  %s2486_s14 = smov %s2485_s25 }
 0x317   : > { %s1298_s4 = sshll.u32 %s1040_s0, 7  ;;  %p1680_p0 = pneg %p1679_p12 }
 0x318   : > { %s2306_s13 = scalar_lea.hbm %s2485_s25, %s1298_s4  ;;  %s1862_s8 = smov [#allocation10]  }
 0x319   : > { %s1681_s7 = sshll.u32 %s1862_s8, 4  ;;  %s1682_s7 = int_to_ptr.vmem [resolvable:$false] %s1681_s7 }
 0x31a   : > { %s1683_s26 = scalar_lea.vmem %s1682_s7, 1024  ;;  %p1684_p2 = scmp.lt.s32.totalorder %s2301_s30, %s1682_s7 }
 0x31b   : > { %p1685_p10 = scmp.lt.s32.totalorder %s1683_s26, %s1677_s6 }
 0x31d   : > { %p1686_p7 = por %p1685_p10, %p1684_p2 }
 0x31f   : > { %p1687_p3 = pnand %p1686_p7, %p1680_p0 }
 0x321   : > { %1690 = shalt.err (!%p1687_p3)
}
 0x322   : > { %s1691_s19 = scalar_lea.hbm %s2306_s13, 512  ;;  %s1695_s3 = scalar_lea.hbm %s2486_s14, 2048 }
 0x323   : > { %p1692_p13 = scmp.ne.s32.totalorder %s2306_s13, %s1691_s19  ;;  %p1696_p5 = scmp.lt.s32.totalorder %s2306_s13, %s2486_s14 }
 0x324   : > { %p1697_p1 = scmp.lt.s32.totalorder %s1695_s3, %s1691_s19 }
 0x325   : > { %p1693_p8 = pnand %p1692_p13, %p2487_p4 }
 0x326   : > { %p1698_p9 = por %p1697_p1, %p1696_p5 }
 0x327   : > { %p1694_p6 = pneg %p1693_p8 }
 0x329   : > { %p1699_p11 = pnand %p1698_p9, %p1694_p6 }
 0x32b   : > { %1702 = shalt.err (!%p1699_p11)
}
 0x32c   : > { %s1863_s17 = smov 256   ;;  %s1864_s11 = smov 512  }
 0x32d   : > { %s1865_s0 = smov 16  }
 0x32e   : > { %1314 = dma.vmem_to_hbm [thread:$0]  (%p2487_p4), %s2301_s30, 512, %s2306_s13, %s2310_s12, %s1863_s17, %s1864_s11, %s1865_s0  }
 0x32f PF: > { %s2488_s4 = sld [smem:[#allocation15_spill]]  ;;  %p1331_p12 = scmp.ge.s32.totalorder %s1853_s9, 2 }
 0x330   : > { %p2489_p0 = scmp.ne.s32.totalorder %s2466_s21, 0 }
 0x332   : > { %p1327_p2 = pnand %p1331_p12, %p2489_p0 }
 0x334   : > { %p1328_p10 = pneg %p1327_p2 }
 0x335   : > { %s1058_s2 = sand.u32 1, %s2488_s4  }
 0x336   : > { %s1059_s5 = scalar_lea.sflag [#allocation6], %s1058_s2 }
 0x337   : > { %1784 = dma.done.wait (%p1328_p10), %s1059_s5, 512  }
 0x338   : > { %1786 = vsyncadd (%p1328_p10), %s1059_s5, 4294966784  ;;  %s24_s9 = sadd.s32 1, %s1853_s9   ;;  %s2491_s27 = sld [smem:[#allocation16_spill]] }
 0x339   : > { %p2338_p7 = scmp.ge.s32.totalorder %s24_s9, 10   ;;  %s2492_s19 = sld [smem:[#allocation17_spill]] }
 0x33a   : > { %s2493_s30 = smov %s2523_s18  ;;  %s2494_s24 = sld [smem:[#allocation18_spill]] }
 0x33b   : > { %s2495_s13 = sld [smem:[#allocation19_spill]]  ;;  %s2503_s20 = smov %s2493_s30 }
 0x33c   : > { %s2496_s26 = sld [smem:[#allocation26_spill]]  ;;  %s2504_s21 = smov %s1805_s22 }
 0x33d   : > { %s2497_s12 = sld [smem:[#allocation22_spill]]  ;;  %s2505_s22 = smov %s1809_s23 }
 0x33e   : > { %s2498_s6 = sld [smem:[#allocation23_spill]]  ;;  %s2501_s18 = smov %s2491_s27 }
 0x33f   : > { %s2499_s7 = sld [smem:[#allocation24_spill]]  ;;  %s2506_s23 = smov %s2136_s15 }
 0x340   : > { %s2500_s8 = sld [smem:[#allocation27_spill]]  ;;  %s2508_s27 = smov %s1829_s28 }
 0x341   : > { %s2507_s25 = smov %s2495_s13  ;;  %s2509_s28 = smov %s1833_s29 }
 0x342   : > { %s2510_s29 = smov %s2091_s1  ;;  %23 = sbr.rel (!%p2338_p7) target bundleno = 21 (0x15), region = 128 }
 0x343   : > { %s2511_s30 = smov %s2497_s12 }
 0x347   :  { %1064 = vsyncpa [#allocation5], 1 }
 0x348   :  { %1066 = vsyncpa [#allocation5 + $0x1], 1 }
 0x349   :  { %1067 = vsyncpa [#allocation8], 1 }
 0x34a   :  { %1069 = vsyncpa [#allocation8 + $0x1], 1 }
 0x34b   :  { %1070 = vsyncpa [#allocation6], 1 }
 0x34c   :  { %1072 = vsyncpa [#allocation6 + $0x1], 1 }

</bundles_post_ra>
